<compile_context>
chip_gen: v7x
topology: tpu7x:2x2x1
jax: 0.10.0
libtpu: 0.0.40
codegen_flags: <defaults>
</compile_context>

<pallas_src>
import math

import jax
import jax.numpy as jnp
from jax.experimental import pallas as pl
from jax.experimental.pallas import tpu as pltpu


def _round_up(x, m):
    return ((x + m - 1) // m) * m


def _make_conv1x1_kernel(bn, c_in, c_out):
    """Kernel for one (bn batches) x (tp pixels) tile.

    x_ref: (bn*c_in,  tp)  -- per-batch channel rows on sublanes, pixels on lanes
    w_ref: (c_out, c_in)   -- full weight, VMEM-resident across the grid
    o_ref: (bn*c_out, tp)
    """

    def kernel(x_ref, w_ref, o_ref):
        w = w_ref[...]
        for b in range(bn):  # static, unrolled at trace time
            x = x_ref[b * c_in:(b + 1) * c_in, :]
            if c_in <= 16:
                # Tiny contraction: unrolled VPU broadcast-MAC over C_in.
                # TODO(synk): if a bundle dump ever shows vld/VALU as binding,
                # switch to sublane-broadcast loads (pl.ds(..., stride=0)).
                acc = (w[:, 0:1].astype(jnp.float32)
                       * x[0:1, :].astype(jnp.float32))
                for ci in range(1, c_in):
                    acc = acc + (w[:, ci:ci + 1].astype(jnp.float32)
                                 * x[ci:ci + 1, :].astype(jnp.float32))
            else:
                # Realistic channel counts: use the MXU.
                acc = jnp.dot(w, x, preferred_element_type=jnp.float32)
            o_ref[b * c_out:(b + 1) * c_out, :] = acc.astype(o_ref.dtype)

    return kernel


def _pick_batch_block(n, c_in, c_out):
    """Smallest batches-per-step making both row groups multiples of 8."""
    need_in = 8 // math.gcd(c_in, 8)
    need_out = 8 // math.gcd(c_out, 8)
    bn = (need_in * need_out) // math.gcd(need_in, need_out)
    if bn >= n:
        return n  # full batch extent per step: always a legal block size
    return bn


def _pick_pixel_tile(hw, rows_in, rows_out, dtype_bytes, budget_bytes):
    """Largest lane-dense pixel tile whose (x + out) block data fits budget."""
    per_col = (_round_up(rows_in, 8) + _round_up(rows_out, 8)) * dtype_bytes
    cap = max(128, (budget_bytes // per_col) // 128 * 128)
    if hw <= cap:
        return hw  # full pixel extent (legal block size even if not 128-mult)
    return cap     # multiple of 128; ragged last block is masked by Pallas


def conv_1x1_forward(x_nchw, weight_oi11, *, block_budget_bytes=4 * 1024 * 1024):
    """1x1 conv, stride 1, no bias (matches torch.nn.Conv2d semantics).

    x_nchw:      (N, C_in, H, W)
    weight_oi11: (C_out, C_in, 1, 1)   (PyTorch Conv2d layout)
    returns:     (N, C_out, H, W)
    """
    N, C_in, H, W = x_nchw.shape
    C_out, C_in_w, kh, kw = weight_oi11.shape
    assert (kh, kw) == (1, 1) and C_in_w == C_in
    HW = H * W

    # TODO(synk): the (H, W) -> (H*W) collapse may be materialized by XLA as a
    # relayout copy for some physical layouts; if profiling shows one, feed the
    # 4-D array directly with a (None, C_in, h_tile, W) block when W is a
    # multiple of 128, or have the producer emit the collapsed layout.
    x2 = x_nchw.reshape(N * C_in, HW)        # batch-major rows, pixels on lanes
    w2 = weight_oi11.reshape(C_out, C_in)

    dtype_bytes = jnp.dtype(x_nchw.dtype).itemsize
    bn = _pick_batch_block(N, C_in, C_out)
    rows_in, rows_out = bn * C_in, bn * C_out
    tp = _pick_pixel_tile(HW, rows_in, rows_out, dtype_bytes, block_budget_bytes)

    grid = (pl.cdiv(N, bn), pl.cdiv(HW, tp))

    out2 = pl.pallas_call(
        _make_conv1x1_kernel(bn, C_in, C_out),
        out_shape=jax.ShapeDtypeStruct((N * C_out, HW), x_nchw.dtype),
        grid_spec=pltpu.PrefetchScalarGridSpec(
            num_scalar_prefetch=0,
            grid=grid,
            in_specs=[
                # bn whole batches of input channels per step, lane-dense pixels.
                pl.BlockSpec((rows_in, tp), lambda b, p: (b, p)),
                # Full weight, constant index_map -> stays resident in VMEM.
                pl.BlockSpec((C_out, C_in), lambda b, p: (0, 0)),
            ],
            out_specs=pl.BlockSpec((rows_out, tp), lambda b, p: (b, p)),
        ),
        compiler_params=pltpu.CompilerParams(
            dimension_semantics=("parallel", "parallel"),
        ),
    )(x2, w2)

    return out2.reshape(N, C_out, H, W)


if __name__ == "__main__":
    key = jax.random.PRNGKey(0)
    k_x, k_w = jax.random.split(key)

    # Small shapes consistent with the module: inplanes=4, planes=8.
    N, C_in, H, W = 2, 4, 16, 16
    C_out = 8

    x = jax.random.normal(k_x, (N, C_in, H, W), dtype=jnp.float32)
    # Conv2d weight shape: (C_out, C_in, 1, 1).
    weight = jax.random.normal(k_w, (C_out, C_in, 1, 1), dtype=jnp.float32) * 0.1

    out = conv_1x1_forward(x, weight)
    jax.block_until_ready(out)

    # Reference: same 1x1 conv as an einsum.
    ref = jnp.einsum("nchw,oc->nohw", x, weight.reshape(C_out, C_in))
    assert out.shape == (N, C_out, H, W)
    assert jnp.allclose(out, ref, atol=1e-5, rtol=1e-5)

    print("KERNEL_OK")
</pallas_src>

<mosaic_0001>
module attributes {stable_mosaic.version = 11 : i64} {
  func.func @kernel(%arg0: i32, %arg1: i32, %arg2: memref<8x256xf32, #tpu.memory_space<vmem>>, %arg3: memref<8x4xf32, #tpu.memory_space<vmem>>, %arg4: memref<16x256xf32, #tpu.memory_space<vmem>>) attributes {dimension_semantics = [#tpu.dimension_semantics<parallel>, #tpu.dimension_semantics<parallel>], iteration_bounds = array<i64: 1, 1>, scalar_prefetch = 0 : i64, scratch_operands = 0 : i64, tpu.core_type = #tpu.core_type<tc>, window_params = [{transform_indices = @transform_0, window_bounds = array<i64: 8, 256>}, {pipeline_mode = #tpu.pipeline_mode<synchronous>, transform_indices = @transform_1, window_bounds = array<i64: 8, 4>}, {transform_indices = @transform_2, window_bounds = array<i64: 16, 256>}]} {
    %c0 = arith.constant 0 : index
    %c0_0 = arith.constant 0 : index
    %0 = vector.load %arg3[%c0, %c0_0] : memref<8x4xf32, #tpu.memory_space<vmem>>, vector<8x4xf32>
    %c0_1 = arith.constant 0 : index
    %c0_2 = arith.constant 0 : index
    %1 = vector.load %arg2[%c0_1, %c0_2] : memref<8x256xf32, #tpu.memory_space<vmem>>, vector<4x256xf32>
    %2 = vector.extract_strided_slice %0 {offsets = [0, 0], sizes = [8, 1], strides = [1, 1]} : vector<8x4xf32> to vector<8x1xf32>
    %3 = vector.extract_strided_slice %1 {offsets = [0, 0], sizes = [1, 256], strides = [1, 1]} : vector<4x256xf32> to vector<1x256xf32>
    %4 = vector.broadcast %2 : vector<8x1xf32> to vector<8x256xf32>
    %5 = vector.broadcast %3 : vector<1x256xf32> to vector<8x256xf32>
    %6 = arith.mulf %4, %5 : vector<8x256xf32>
    %7 = vector.extract_strided_slice %0 {offsets = [0, 1], sizes = [8, 1], strides = [1, 1]} : vector<8x4xf32> to vector<8x1xf32>
    %8 = vector.extract_strided_slice %1 {offsets = [1, 0], sizes = [1, 256], strides = [1, 1]} : vector<4x256xf32> to vector<1x256xf32>
    %9 = vector.broadcast %7 : vector<8x1xf32> to vector<8x256xf32>
    %10 = vector.broadcast %8 : vector<1x256xf32> to vector<8x256xf32>
    %11 = arith.mulf %9, %10 : vector<8x256xf32>
    %12 = arith.addf %6, %11 : vector<8x256xf32>
    %13 = vector.extract_strided_slice %0 {offsets = [0, 2], sizes = [8, 1], strides = [1, 1]} : vector<8x4xf32> to vector<8x1xf32>
    %14 = vector.extract_strided_slice %1 {offsets = [2, 0], sizes = [1, 256], strides = [1, 1]} : vector<4x256xf32> to vector<1x256xf32>
    %15 = vector.broadcast %13 : vector<8x1xf32> to vector<8x256xf32>
    %16 = vector.broadcast %14 : vector<1x256xf32> to vector<8x256xf32>
    %17 = arith.mulf %15, %16 : vector<8x256xf32>
    %18 = arith.addf %12, %17 : vector<8x256xf32>
    %19 = vector.extract_strided_slice %0 {offsets = [0, 3], sizes = [8, 1], strides = [1, 1]} : vector<8x4xf32> to vector<8x1xf32>
    %20 = vector.extract_strided_slice %1 {offsets = [3, 0], sizes = [1, 256], strides = [1, 1]} : vector<4x256xf32> to vector<1x256xf32>
    %21 = vector.broadcast %19 : vector<8x1xf32> to vector<8x256xf32>
    %22 = vector.broadcast %20 : vector<1x256xf32> to vector<8x256xf32>
    %23 = arith.mulf %21, %22 : vector<8x256xf32>
    %24 = arith.addf %18, %23 : vector<8x256xf32>
    %c0_3 = arith.constant 0 : index
    %c0_4 = arith.constant 0 : index
    %25 = vector.load %arg4[%c0_3, %c0_4] : memref<16x256xf32, #tpu.memory_space<vmem>>, vector<8x256xf32>
    tpu.vector_store %arg4[%c0_3, %c0_4], %24 {strides = array<i32>} : memref<16x256xf32, #tpu.memory_space<vmem>>, vector<8x256xf32>,
    %c4 = arith.constant 4 : index
    %c0_5 = arith.constant 0 : index
    %26 = vector.load %arg2[%c4, %c0_5] : memref<8x256xf32, #tpu.memory_space<vmem>>, vector<4x256xf32>
    %27 = vector.extract_strided_slice %0 {offsets = [0, 0], sizes = [8, 1], strides = [1, 1]} : vector<8x4xf32> to vector<8x1xf32>
    %28 = vector.extract_strided_slice %26 {offsets = [0, 0], sizes = [1, 256], strides = [1, 1]} : vector<4x256xf32> to vector<1x256xf32>
    %29 = vector.broadcast %27 : vector<8x1xf32> to vector<8x256xf32>
    %30 = vector.broadcast %28 : vector<1x256xf32> to vector<8x256xf32>
    %31 = arith.mulf %29, %30 : vector<8x256xf32>
    %32 = vector.extract_strided_slice %0 {offsets = [0, 1], sizes = [8, 1], strides = [1, 1]} : vector<8x4xf32> to vector<8x1xf32>
    %33 = vector.extract_strided_slice %26 {offsets = [1, 0], sizes = [1, 256], strides = [1, 1]} : vector<4x256xf32> to vector<1x256xf32>
    %34 = vector.broadcast %32 : vector<8x1xf32> to vector<8x256xf32>
    %35 = vector.broadcast %33 : vector<1x256xf32> to vector<8x256xf32>
    %36 = arith.mulf %34, %35 : vector<8x256xf32>
    %37 = arith.addf %31, %36 : vector<8x256xf32>
    %38 = vector.extract_strided_slice %0 {offsets = [0, 2], sizes = [8, 1], strides = [1, 1]} : vector<8x4xf32> to vector<8x1xf32>
    %39 = vector.extract_strided_slice %26 {offsets = [2, 0], sizes = [1, 256], strides = [1, 1]} : vector<4x256xf32> to vector<1x256xf32>
    %40 = vector.broadcast %38 : vector<8x1xf32> to vector<8x256xf32>
    %41 = vector.broadcast %39 : vector<1x256xf32> to vector<8x256xf32>
    %42 = arith.mulf %40, %41 : vector<8x256xf32>
    %43 = arith.addf %37, %42 : vector<8x256xf32>
    %44 = vector.extract_strided_slice %0 {offsets = [0, 3], sizes = [8, 1], strides = [1, 1]} : vector<8x4xf32> to vector<8x1xf32>
    %45 = vector.extract_strided_slice %26 {offsets = [3, 0], sizes = [1, 256], strides = [1, 1]} : vector<4x256xf32> to vector<1x256xf32>
    %46 = vector.broadcast %44 : vector<8x1xf32> to vector<8x256xf32>
    %47 = vector.broadcast %45 : vector<1x256xf32> to vector<8x256xf32>
    %48 = arith.mulf %46, %47 : vector<8x256xf32>
    %49 = arith.addf %43, %48 : vector<8x256xf32>
    %c8 = arith.constant 8 : index
    %c0_6 = arith.constant 0 : index
    %50 = vector.load %arg4[%c8, %c0_6] : memref<16x256xf32, #tpu.memory_space<vmem>>, vector<8x256xf32>
    tpu.vector_store %arg4[%c8, %c0_6], %49 {strides = array<i32>} : memref<16x256xf32, #tpu.memory_space<vmem>>, vector<8x256xf32>,
    return
  }
  func.func @transform_0(%arg0: i32, %arg1: i32) -> (i32, i32) {
    %c0_i32 = arith.constant 0 : i32
    return %arg0, %arg1 : i32, i32
  }
  func.func @transform_1(%arg0: i32, %arg1: i32) -> (i32, i32) {
    %c0_i32 = arith.constant 0 : i32
    %c0_i32_0 = arith.constant 0 : i32
    %c0_i32_1 = arith.constant 0 : i32
    return %c0_i32, %c0_i32_0 : i32, i32
  }
  func.func @transform_2(%arg0: i32, %arg1: i32) -> (i32, i32) {
    %c0_i32 = arith.constant 0 : i32
    return %arg0, %arg1 : i32, i32
  }
}

</mosaic_0001>

<bundles_post_ra>
// kernel: tpu_custom_call.1
= control target key start
LH: loop header
LB: loop body
LE: loop exit
PB: predicated region body
PF: predicated region fallthrough
CT: control target
= control target key end

     0   :  { %7 = vsyncpa [#allocation3], 0  ;;  %s270_s0 = inlined_call_operand.hbm [shape: f32[8,256], index: 0, kind: input, shape index: {}]   ;;  %s271_s1 = inlined_call_operand.vmem [shape: f32[8,4], index: 1, kind: input, shape index: {}]   ;;  %s272_s2 = inlined_call_operand.hbm [shape: f32[16,256], index: 2, kind: output, shape index: {}]  }
   0x1   :  { %8 = vsyncpa [#allocation4], 0  ;;  %s220_s9 = smov [#allocation2]   ;;  %s172_s13 = scalar_lea.hbm %s270_s0, 256 }
   0x2   :  { %s15_s10 = sshll.u32 %s220_s9, 4  ;;  %p173_p0 = scmp.ne.s32.totalorder %s270_s0, %s172_s13  ;;  %s16_s10 = int_to_ptr.vmem [resolvable:$true] %s15_s10 }
   0x3   :  { %p176_p1 = scmp.lt.u32.totalorder %s172_s13, %s270_s0 }
   0x5   :  { %p178_p2 = pnand %p176_p1, %p173_p0 }
   0x7   :  { %181 = shalt.err (!%p178_p2)
}
   0x8   :  { %s182_s18 = scalar_lea.vmem %s16_s10, 256  ;;  %p187_p4 = scmp.lt.s32.totalorder %s16_s10, %s16_s10 }
   0x9   :  { %p183_p3 = scmp.ne.s32.totalorder %s16_s10, %s182_s18  ;;  %p188_p5 = scmp.lt.s32.totalorder %s182_s18, %s182_s18 }
   0xb   :  { %p189_p6 = por %p188_p5, %p187_p4 }
   0xd   :  { %p190_p7 = pnand %p189_p6, %p183_p3 }
   0xf   :  { %193 = shalt.err (!%p190_p7)
}
  0x10   :  { %18 = dma.hbm_to_vmem [thread:$0]  %s270_s0, 256, %s16_s10, [#allocation3]  }
  0x11   :  { %216 = dma.done.wait [#allocation3], 256  }
  0x12   :  { %217 = vsyncadd [#allocation3], 4294967040  ;;  %v221_v0 = vmov 0   ;;  %v222_v1 = vmov 2   ;;  %v24_v2 = vld [vmem:[%s271_s1] sm:$0xff]  ;;  %v223_v3 = vmov 1   ;;  %v32_v5 = vlaneseq }
  0x13   :  { %167 = vset.pattern.permute.xlu0 %v221_v0  ;;  %169 = vset.pattern.permute.xlu1 %v222_v1  ;;  %v224_v4 = vmov 3   ;;  %v25_v7 = vld [vmem:[#allocation2] sm:$0xf]  ;;  %v26_v8 = vld [vmem:[#allocation2 + $0x8] sm:$0xf]  ;;  %s225_s0 = smov [#allocation5]  }
  0x14   :  { %29 = vperm.xlu0 %167, %v24_v2   ;;  %59 = vperm.xlu1 %169, %v24_v2   ;;  %v33_v6 = vshrl.u32 %v32_v5, 7  ;;  %v92_v11 = vld [vmem:[#allocation2] sm:$0xf0]  ;;  %v93_v12 = vld [vmem:[#allocation2 + $0x8] sm:$0xf0]  ;;  %s147_s1 = sshll.u32 %s225_s0, 4  ;;  %s148_s1 = int_to_ptr.vmem [resolvable:$true] %s147_s1 }
  0x15   :  { %s194_s23 = scalar_lea.vmem %s148_s1, 512  ;;  %p199_p9 = scmp.lt.s32.totalorder %s148_s1, %s148_s1 }
  0x16   :  { %v34_v9 = vsub.s32 0, %v33_v6  ;;  %v96_v10 = vsub.s32 4, %v33_v6  ;;  %v64_v13 = vsub.s32 2, %v33_v6  ;;  %v118_v14 = vsub.s32 6, %v33_v6  ;;  %p195_p8 = scmp.ne.s32.totalorder %s148_s1, %s194_s23  ;;  %p200_p10 = scmp.lt.s32.totalorder %s194_s23, %s194_s23 }
  0x17   :  { %v48_v15 = vsub.s32 1, %v33_v6  ;;  %v106_v16 = vsub.s32 5, %v33_v6  ;;  %v80_v17 = vsub.s32 3, %v33_v6  ;;  %v130_v18 = vsub.s32 7, %v33_v6 }
  0x18   :  { %168 = vset.pattern.permute.xlu0 %v223_v3  ;;  %170 = vset.pattern.permute.xlu1 %v224_v4  ;;  %v35_v19 = vrot.slane %v25_v7, %v34_v9  ;;  %v39_v20 = vrot.slane %v26_v8, %v34_v9  ;;  %v97_v21 = vrot.slane %v92_v11, %v96_v10  ;;  %p201_p11 = por %p200_p10, %p199_p9 }
  0x19   :  { %43 = vperm.xlu0 %168, %v24_v2   ;;  %75 = vperm.xlu1 %170, %v24_v2   ;;  %v101_v22 = vrot.slane %v93_v12, %v96_v10  ;;  %v65_v25 = vrot.slane %v25_v7, %v64_v13  ;;  %v69_v26 = vrot.slane %v26_v8, %v64_v13 }
  0x1a   :  { %v119_v27 = vrot.slane %v92_v11, %v118_v14  ;;  %v123_v28 = vrot.slane %v93_v12, %v118_v14  ;;  %v49_v29 = vrot.slane %v25_v7, %v48_v15  ;;  %v53_v30 = vrot.slane %v26_v8, %v48_v15  ;;  %p202_p12 = pnand %p201_p11, %p195_p8 }
  0x1b   :  { %v107_v31 = vrot.slane %v92_v11, %v106_v16  ;;  %v111_v32 = vrot.slane %v93_v12, %v106_v16  ;;  %v81_v33 = vrot.slane %v25_v7, %v80_v17  ;;  %v85_v34 = vrot.slane %v26_v8, %v80_v17 }
  0x1c   :  { %v131_v35 = vrot.slane %v92_v11, %v130_v18  ;;  %v135_v36 = vrot.slane %v93_v12, %v130_v18 }
  0x1d   :  { %171 = vset.pattern.permute.xlu0 %v224_v4 }
  0x93   :  { %v30_v23 = vpop.permute.xlu0 %29  ;;  %v60_v24 = vpop.permute.xlu1 %59 }
  0x94   :  { %v40_v37 = vmul.f32 %v35_v19, %v30_v23  ;;  %v41_v38 = vmul.f32 %v39_v20, %v30_v23  ;;  %v102_v39 = vmul.f32 %v97_v21, %v30_v23  ;;  %v103_v40 = vmul.f32 %v101_v22, %v30_v23 }
  0x95   :  { %v70_v41 = vmul.f32 %v65_v25, %v60_v24  ;;  %v71_v42 = vmul.f32 %v69_v26, %v60_v24  ;;  %v124_v43 = vmul.f32 %v119_v27, %v60_v24  ;;  %v125_v44 = vmul.f32 %v123_v28, %v60_v24 }
  0x98   :  { %v44_v45 = vpop.permute.xlu0 %43  ;;  %v76_v46 = vpop.permute.xlu1 %75 }
  0x99   :  { %v54_v47 = vmul.f32 %v49_v29, %v44_v45  ;;  %v55_v48 = vmul.f32 %v53_v30, %v44_v45  ;;  %v112_v49 = vmul.f32 %v107_v31, %v44_v45  ;;  %v113_v50 = vmul.f32 %v111_v32, %v44_v45 }
  0x9a   :  { %v86_v51 = vmul.f32 %v81_v33, %v76_v46  ;;  %v87_v52 = vmul.f32 %v85_v34, %v76_v46  ;;  %v136_v53 = vmul.f32 %v131_v35, %v76_v46  ;;  %v137_v54 = vmul.f32 %v135_v36, %v76_v46 }
  0x9b   :  { %v56_v55 = vadd.f32 %v54_v47, %v40_v37  ;;  %v57_v56 = vadd.f32 %v55_v48, %v41_v38  ;;  %v114_v57 = vadd.f32 %v112_v49, %v102_v39  ;;  %v115_v58 = vadd.f32 %v113_v50, %v103_v40 }
  0x9d   :  { %v72_v59 = vadd.f32 %v70_v41, %v56_v55  ;;  %v73_v60 = vadd.f32 %v71_v42, %v57_v56  ;;  %v126_v61 = vadd.f32 %v124_v43, %v114_v57  ;;  %v127_v62 = vadd.f32 %v125_v44, %v115_v58 }
  0x9f   :  { %v88_v63 = vadd.f32 %v86_v51, %v72_v59  ;;  %v89_v0 = vadd.f32 %v87_v52, %v73_v60  ;;  %v138_v1 = vadd.f32 %v136_v53, %v126_v61  ;;  %v139_v2 = vadd.f32 %v137_v54, %v127_v62 }
  0xa1   :  { %90 = vst [vmem:[#allocation5] sm:$0xff] %v88_v63  ;;  %91 = vst [vmem:[#allocation5 + $0x8] sm:$0xff] %v89_v0 }
  0xa2   :  { %140 = vst [vmem:[#allocation5 + $0x10] sm:$0xff] %v138_v1  ;;  %141 = vst [vmem:[#allocation5 + $0x18] sm:$0xff] %v139_v2 }
  0xa3   :  { %205 = shalt.err (!%p202_p12)
}
  0xa4   :  { %s206_s26 = scalar_lea.hbm %s272_s2, 512 }
  0xa5   :  { %p207_p13 = scmp.ne.s32.totalorder %s272_s2, %s206_s26  ;;  %p210_p0 = scmp.lt.u32.totalorder %s206_s26, %s272_s2 }
  0xa7   :  { %p212_p1 = pnand %p210_p0, %p207_p13 }
  0xa9   :  { %215 = shalt.err (!%p212_p1)
}
  0xaa   :  { %s226_s3 = smov 256   ;;  %s227_s4 = smov 16  }
  0xab   :  { %153 = dma.vmem_to_hbm [thread:$0]  %s148_s1, 512, %s272_s2, [#allocation4], %s226_s3, %s226_s3, %s227_s4  }
  0xac   :  { %218 = dma.done.wait [#allocation4], 512  }
  0xad   :  { %219 = vsyncadd [#allocation4], 4294966784 }
  0xae   :  { %157 = vsyncpa [#allocation3], 1 }
  0xaf   :  { %158 = vsyncpa [#allocation4], 1 }

</bundles_post_ra>
